<compile_context>
chip_gen: v6e
topology: v6e:2x2x1
jax: 0.10.0
libtpu: 0.0.40
codegen_flags: <defaults>
</compile_context>

<pallas_src>
import math
import functools

import jax
import jax.numpy as jnp
from jax.experimental import pallas as pl
from jax.experimental.pallas import tpu as pltpu

LN_EPS = 1e-5   # nn.LayerNorm default
LANE = 128      # TPU lane width


def _round_up(x, m):
    return ((x + m - 1) // m) * m


# ----------------------------- fused kernel --------------------------------

def _mlp_kernel(num_hidden, hidden_dims, *refs):
    """Fused MLP. refs = [x, (w, b, gamma, beta) * num_hidden, w_f, b_f, out]."""
    x_ref = refs[0]
    o_ref = refs[-1]
    prefs = refs[1:-1]

    # Input tile arrives as bf16 (lane-dense, zero-padded); first matmul
    # consumes it directly on the MXU.
    h = x_ref[...]                                    # (TILE_B, Din_pad) bf16
    idx = 0
    for layer in range(num_hidden):
        w_ref, b_ref, g_ref, be_ref = prefs[idx:idx + 4]
        idx += 4
        d_true = hidden_dims[layer]

        # Linear: bf16 x bf16 on the MXU, f32 accumulation.
        y = jnp.dot(h.astype(jnp.bfloat16), w_ref[...],
                    preferred_element_type=jnp.float32)
        y = y + b_ref[...]                            # (1, Dout_pad) broadcast

        # LayerNorm over the TRUE feature count.  Padded lanes of y are
        # exactly 0 (zero weight columns + zero bias), so a single pass of
        # sum / sum-of-squares over all lanes gives the unpadded statistics.
        inv_d = 1.0 / d_true
        s1 = jnp.sum(y, axis=-1, keepdims=True)
        s2 = jnp.sum(y * y, axis=-1, keepdims=True)
        mean = s1 * inv_d
        var = s2 * inv_d - mean * mean
        y = (y - mean) * jax.lax.rsqrt(var + LN_EPS)
        # gamma/beta are 0 in padded lanes -> padded activations return to 0.
        y = y * g_ref[...] + be_ref[...]

        # ReLU; Dropout is identity in inference mode.
        h = jnp.maximum(y, 0.0)

    w_ref, b_ref = prefs[idx], prefs[idx + 1]
    o_ref[...] = jnp.dot(h.astype(jnp.bfloat16), w_ref[...],
                         preferred_element_type=jnp.float32) + b_ref[...]


# ----------------------------- wrapper --------------------------------------

@functools.partial(jax.jit, static_argnums=(2,))
def unified_classifier_forward(x, flat_params, config):
    """x: (B, in_features) f32.
       flat_params: tuple of padded arrays [w,b,gamma,beta]*H + [w_f, b_f].
       config: (in_features, hidden_dims_tuple, num_classes) -- static."""
    in_features, hidden_dims, num_classes = config
    hidden_dims = tuple(hidden_dims)
    num_hidden = len(hidden_dims)

    B = x.shape[0]
    din_pad = _round_up(in_features, LANE)
    c_pad = _round_up(num_classes, LANE)

    # Batch tiling: large row tiles feed the MXU; tiny batches use one tile.
    tile_b = 256 if B >= 256 else _round_up(B, 8)
    b_pad = _round_up(B, tile_b)

    # Zero-pad the input to lane-dense / tile-aligned extents; feed bf16
    # (matmul operands are bf16 anyway, halves the input DMA bytes).
    x_p = jnp.pad(x.astype(jnp.bfloat16),
                  ((0, b_pad - B), (0, din_pad - in_features)))

    grid = (b_pad // tile_b,)

    in_specs = [pl.BlockSpec((tile_b, din_pad), lambda i: (i, 0))]
    for arr in flat_params:
        in_specs.append(pl.BlockSpec(arr.shape, lambda i: (0, 0)))
    out_specs = pl.BlockSpec((tile_b, c_pad), lambda i: (i, 0))

    # VMEM budget: 2x for pipeline double-buffering + slack, clamped so the
    # requested limit is always valid on v7x (64 MiB physical VMEM).
    in_bytes = tile_b * din_pad * 2 + sum(
        a.size * a.dtype.itemsize for a in flat_params)
    out_bytes = tile_b * c_pad * 4
    vmem_need = 2 * (in_bytes + out_bytes) + (1 << 20)
    vmem_limit = int(min(max(vmem_need, 32 * 1024 * 1024), 64 * 1024 * 1024))

    kernel = functools.partial(_mlp_kernel, num_hidden, hidden_dims)

    out = pl.pallas_call(
        kernel,
        out_shape=jax.ShapeDtypeStruct((b_pad, c_pad), jnp.float32),
        grid=grid,
        in_specs=in_specs,
        out_specs=out_specs,
        compiler_params=pltpu.CompilerParams(
            dimension_semantics=("parallel",),
            vmem_limit_bytes=vmem_limit),
    )(x_p, *flat_params)

    # Slice the lane-dense slab back to the true logits width / batch.
    return out[:B, :num_classes]


# ----------------------------- parameter init ------------------------------

def init_unified_classifier(key, in_features, hidden_dims, num_classes):
    """Matches _initialize_weights:
       Linear: kaiming_normal_(mode='fan_out', relu) -> std = sqrt(2/out_features), bias 0
       LayerNorm: weight=1, bias=0 (PyTorch default).
       Weights are stored transposed (Din, Dout), zero-padded to multiples of
       128 on both axes, and cast to bf16 for the MXU.  gamma is 0 in padded
       lanes so padded activations stay zero through the stack."""
    if not isinstance(hidden_dims, (list, tuple)):
        hidden_dims = [hidden_dims]
    hidden_dims = list(hidden_dims)

    flat = []
    prev = in_features
    for dim in hidden_dims:
        key, k = jax.random.split(key)
        std = math.sqrt(2.0 / dim)  # fan_out = out_features
        w = jax.random.normal(k, (prev, dim), jnp.float32) * std
        w_p = jnp.zeros((_round_up(prev, LANE), _round_up(dim, LANE)),
                        jnp.float32).at[:prev, :dim].set(w).astype(jnp.bfloat16)
        b = jnp.zeros((1, _round_up(dim, LANE)), jnp.float32)
        gamma = jnp.zeros((1, _round_up(dim, LANE)),
                          jnp.float32).at[:, :dim].set(1.0)
        beta = jnp.zeros((1, _round_up(dim, LANE)), jnp.float32)
        flat += [w_p, b, gamma, beta]
        prev = dim

    key, k = jax.random.split(key)
    std = math.sqrt(2.0 / num_classes)
    w = jax.random.normal(k, (prev, num_classes), jnp.float32) * std
    w_p = jnp.zeros((_round_up(prev, LANE), _round_up(num_classes, LANE)),
                    jnp.float32).at[:prev, :num_classes].set(w).astype(jnp.bfloat16)
    b = jnp.zeros((1, _round_up(num_classes, LANE)), jnp.float32)
    flat += [w_p, b]

    config = (in_features, tuple(hidden_dims), num_classes)
    return tuple(flat), config


# ----------------------------- reference (plain JAX) ------------------------

def reference_forward(x, flat_params, config):
    """Plain-JAX reference with the same bf16 rounding points as the kernel
       (bf16 weights, activations rounded to bf16 before each matmul), but
       standard two-pass LayerNorm on the unpadded arrays."""
    in_features, hidden_dims, num_classes = config
    h = x.astype(jnp.float32)
    idx = 0
    prev = in_features
    for dim in hidden_dims:
        w_p, b, gamma, beta = flat_params[idx:idx + 4]
        idx += 4
        w = w_p[:prev, :dim].astype(jnp.float32)
        hb = h.astype(jnp.bfloat16).astype(jnp.float32)
        y = hb @ w + b[:, :dim]
        mean = jnp.mean(y, axis=-1, keepdims=True)
        var = jnp.mean((y - mean) ** 2, axis=-1, keepdims=True)
        y = (y - mean) / jnp.sqrt(var + LN_EPS)
        y = y * gamma[:, :dim] + beta[:, :dim]
        h = jnp.maximum(y, 0.0)
        prev = dim
    w_p, b = flat_params[idx], flat_params[idx + 1]
    w = w_p[:prev, :num_classes].astype(jnp.float32)
    hb = h.astype(jnp.bfloat16).astype(jnp.float32)
    return hb @ w + b[:, :num_classes]


# ----------------------------- main -----------------------------------------

if __name__ == "__main__":
    key = jax.random.PRNGKey(0)

    batch = 8
    in_features = 32
    hidden_dims = [64, 32]
    num_classes = 10

    kx, kp = jax.random.split(key)
    x = jax.random.normal(kx, (batch, in_features), dtype=jnp.float32)

    flat_params, config = init_unified_classifier(
        kp, in_features, hidden_dims, num_classes)

    out = unified_classifier_forward(x, flat_params, config)
    out = jax.block_until_ready(out)

    ref = reference_forward(x, flat_params, config)

    assert out.shape == (batch, num_classes), out.shape
    max_err = float(jnp.max(jnp.abs(out - ref)))
    # bf16 matmul operands with f32 accumulation: only accumulation-order /
    # rounding-point noise vs the bf16-consistent reference.
    assert max_err < 1e-2, max_err

    print("KERNEL_OK")
</pallas_src>

<mosaic_0001>
module attributes {stable_mosaic.version = 11 : i64} {
  func.func @_mlp_kernel(%arg0: i32, %arg1: memref<8x128xbf16, #tpu.memory_space<vmem>>, %arg2: memref<128x128xbf16, #tpu.memory_space<vmem>>, %arg3: memref<1x128xf32, #tpu.memory_space<vmem>>, %arg4: memref<1x128xf32, #tpu.memory_space<vmem>>, %arg5: memref<1x128xf32, #tpu.memory_space<vmem>>, %arg6: memref<128x128xbf16, #tpu.memory_space<vmem>>, %arg7: memref<1x128xf32, #tpu.memory_space<vmem>>, %arg8: memref<1x128xf32, #tpu.memory_space<vmem>>, %arg9: memref<1x128xf32, #tpu.memory_space<vmem>>, %arg10: memref<128x128xbf16, #tpu.memory_space<vmem>>, %arg11: memref<1x128xf32, #tpu.memory_space<vmem>>, %arg12: memref<8x128xf32, #tpu.memory_space<vmem>>) attributes {dimension_semantics = [#tpu.dimension_semantics<parallel>], iteration_bounds = array<i64: 1>, scalar_prefetch = 0 : i64, scratch_operands = 0 : i64, tpu.core_type = #tpu.core_type<tc>, window_params = [{transform_indices = @transform_0, window_bounds = array<i64: 8, 128>}, {pipeline_mode = #tpu.pipeline_mode<synchronous>, transform_indices = @transform_1, window_bounds = array<i64: 128, 128>}, {pipeline_mode = #tpu.pipeline_mode<synchronous>, transform_indices = @transform_2, window_bounds = array<i64: 1, 128>}, {pipeline_mode = #tpu.pipeline_mode<synchronous>, transform_indices = @transform_3, window_bounds = array<i64: 1, 128>}, {pipeline_mode = #tpu.pipeline_mode<synchronous>, transform_indices = @transform_4, window_bounds = array<i64: 1, 128>}, {pipeline_mode = #tpu.pipeline_mode<synchronous>, transform_indices = @transform_5, window_bounds = array<i64: 128, 128>}, {pipeline_mode = #tpu.pipeline_mode<synchronous>, transform_indices = @transform_6, window_bounds = array<i64: 1, 128>}, {pipeline_mode = #tpu.pipeline_mode<synchronous>, transform_indices = @transform_7, window_bounds = array<i64: 1, 128>}, {pipeline_mode = #tpu.pipeline_mode<synchronous>, transform_indices = @transform_8, window_bounds = array<i64: 1, 128>}, {pipeline_mode = #tpu.pipeline_mode<synchronous>, transform_indices = @transform_9, window_bounds = array<i64: 128, 128>}, {pipeline_mode = #tpu.pipeline_mode<synchronous>, transform_indices = @transform_10, window_bounds = array<i64: 1, 128>}, {transform_indices = @transform_11, window_bounds = array<i64: 8, 128>}]} {
    %c0 = arith.constant 0 : index
    %c0_0 = arith.constant 0 : index
    %0 = vector.load %arg1[%c0, %c0_0] : memref<8x128xbf16, #tpu.memory_space<vmem>>, vector<8x128xbf16>
    %c0_1 = arith.constant 0 : index
    %c0_2 = arith.constant 0 : index
    %1 = vector.load %arg2[%c0_1, %c0_2] : memref<128x128xbf16, #tpu.memory_space<vmem>>, vector<128x128xbf16>
    %cst = arith.constant dense<0.000000e+00> : vector<8x128xf32>
    %2 = tpu.matmul %0, %1, %cst {dimension_numbers = #tpu.dot_dimension_numbers<[1], [0], [0], [1], [0, 0, 1, 1], [], []>} : vector<8x128xbf16>, vector<128x128xbf16>, vector<8x128xf32> -> vector<8x128xf32>
    %c0_3 = arith.constant 0 : index
    %c0_4 = arith.constant 0 : index
    %3 = vector.load %arg3[%c0_3, %c0_4] : memref<1x128xf32, #tpu.memory_space<vmem>>, vector<1x128xf32>
    %4 = vector.broadcast %3 : vector<1x128xf32> to vector<8x128xf32>
    %5 = arith.addf %2, %4 : vector<8x128xf32>
    %cst_5 = arith.constant dense<0.000000e+00> : vector<8xf32>
    %6 = vector.multi_reduction <add>, %5, %cst_5 [1] : vector<8x128xf32> to vector<8xf32>
    %7 = vector.shape_cast %6 : vector<8xf32> to vector<8x1xf32>
    %8 = arith.mulf %5, %5 : vector<8x128xf32>
    %cst_6 = arith.constant dense<0.000000e+00> : vector<8xf32>
    %9 = vector.multi_reduction <add>, %8, %cst_6 [1] : vector<8x128xf32> to vector<8xf32>
    %10 = vector.shape_cast %9 : vector<8xf32> to vector<8x1xf32>
    %cst_7 = arith.constant 1.562500e-02 : f32
    %11 = vector.broadcast %cst_7 : f32 to vector<8x1xf32>
    %12 = arith.mulf %7, %11 : vector<8x1xf32>
    %cst_8 = arith.constant 1.562500e-02 : f32
    %13 = vector.broadcast %cst_8 : f32 to vector<8x1xf32>
    %14 = arith.mulf %10, %13 : vector<8x1xf32>
    %15 = arith.mulf %12, %12 : vector<8x1xf32>
    %16 = arith.subf %14, %15 : vector<8x1xf32>
    %17 = vector.broadcast %12 : vector<8x1xf32> to vector<8x128xf32>
    %18 = arith.subf %5, %17 : vector<8x128xf32>
    %cst_9 = arith.constant 9.99999974E-6 : f32
    %19 = vector.broadcast %cst_9 : f32 to vector<8x1xf32>
    %20 = arith.addf %16, %19 : vector<8x1xf32>
    %21 = math.rsqrt %20 : vector<8x1xf32>
    %22 = vector.broadcast %21 : vector<8x1xf32> to vector<8x128xf32>
    %23 = arith.mulf %18, %22 : vector<8x128xf32>
    %c0_10 = arith.constant 0 : index
    %c0_11 = arith.constant 0 : index
    %24 = vector.load %arg4[%c0_10, %c0_11] : memref<1x128xf32, #tpu.memory_space<vmem>>, vector<1x128xf32>
    %25 = vector.broadcast %24 : vector<1x128xf32> to vector<8x128xf32>
    %26 = arith.mulf %23, %25 : vector<8x128xf32>
    %c0_12 = arith.constant 0 : index
    %c0_13 = arith.constant 0 : index
    %27 = vector.load %arg5[%c0_12, %c0_13] : memref<1x128xf32, #tpu.memory_space<vmem>>, vector<1x128xf32>
    %28 = vector.broadcast %27 : vector<1x128xf32> to vector<8x128xf32>
    %29 = arith.addf %26, %28 : vector<8x128xf32>
    %cst_14 = arith.constant 0.000000e+00 : f32
    %30 = vector.broadcast %cst_14 : f32 to vector<8x128xf32>
    %31 = arith.maximumf %29, %30 : vector<8x128xf32>
    %32 = arith.truncf %31 : vector<8x128xf32> to vector<8x128xbf16>
    %c0_15 = arith.constant 0 : index
    %c0_16 = arith.constant 0 : index
    %33 = vector.load %arg6[%c0_15, %c0_16] : memref<128x128xbf16, #tpu.memory_space<vmem>>, vector<128x128xbf16>
    %cst_17 = arith.constant dense<0.000000e+00> : vector<8x128xf32>
    %34 = tpu.matmul %32, %33, %cst_17 {dimension_numbers = #tpu.dot_dimension_numbers<[1], [0], [0], [1], [0, 0, 1, 1], [], []>} : vector<8x128xbf16>, vector<128x128xbf16>, vector<8x128xf32> -> vector<8x128xf32>
    %c0_18 = arith.constant 0 : index
    %c0_19 = arith.constant 0 : index
    %35 = vector.load %arg7[%c0_18, %c0_19] : memref<1x128xf32, #tpu.memory_space<vmem>>, vector<1x128xf32>
    %36 = vector.broadcast %35 : vector<1x128xf32> to vector<8x128xf32>
    %37 = arith.addf %34, %36 : vector<8x128xf32>
    %cst_20 = arith.constant dense<0.000000e+00> : vector<8xf32>
    %38 = vector.multi_reduction <add>, %37, %cst_20 [1] : vector<8x128xf32> to vector<8xf32>
    %39 = vector.shape_cast %38 : vector<8xf32> to vector<8x1xf32>
    %40 = arith.mulf %37, %37 : vector<8x128xf32>
    %cst_21 = arith.constant dense<0.000000e+00> : vector<8xf32>
    %41 = vector.multi_reduction <add>, %40, %cst_21 [1] : vector<8x128xf32> to vector<8xf32>
    %42 = vector.shape_cast %41 : vector<8xf32> to vector<8x1xf32>
    %cst_22 = arith.constant 3.125000e-02 : f32
    %43 = vector.broadcast %cst_22 : f32 to vector<8x1xf32>
    %44 = arith.mulf %39, %43 : vector<8x1xf32>
    %cst_23 = arith.constant 3.125000e-02 : f32
    %45 = vector.broadcast %cst_23 : f32 to vector<8x1xf32>
    %46 = arith.mulf %42, %45 : vector<8x1xf32>
    %47 = arith.mulf %44, %44 : vector<8x1xf32>
    %48 = arith.subf %46, %47 : vector<8x1xf32>
    %49 = vector.broadcast %44 : vector<8x1xf32> to vector<8x128xf32>
    %50 = arith.subf %37, %49 : vector<8x128xf32>
    %cst_24 = arith.constant 9.99999974E-6 : f32
    %51 = vector.broadcast %cst_24 : f32 to vector<8x1xf32>
    %52 = arith.addf %48, %51 : vector<8x1xf32>
    %53 = math.rsqrt %52 : vector<8x1xf32>
    %54 = vector.broadcast %53 : vector<8x1xf32> to vector<8x128xf32>
    %55 = arith.mulf %50, %54 : vector<8x128xf32>
    %c0_25 = arith.constant 0 : index
    %c0_26 = arith.constant 0 : index
    %56 = vector.load %arg8[%c0_25, %c0_26] : memref<1x128xf32, #tpu.memory_space<vmem>>, vector<1x128xf32>
    %57 = vector.broadcast %56 : vector<1x128xf32> to vector<8x128xf32>
    %58 = arith.mulf %55, %57 : vector<8x128xf32>
    %c0_27 = arith.constant 0 : index
    %c0_28 = arith.constant 0 : index
    %59 = vector.load %arg9[%c0_27, %c0_28] : memref<1x128xf32, #tpu.memory_space<vmem>>, vector<1x128xf32>
    %60 = vector.broadcast %59 : vector<1x128xf32> to vector<8x128xf32>
    %61 = arith.addf %58, %60 : vector<8x128xf32>
    %cst_29 = arith.constant 0.000000e+00 : f32
    %62 = vector.broadcast %cst_29 : f32 to vector<8x128xf32>
    %63 = arith.maximumf %61, %62 : vector<8x128xf32>
    %64 = arith.truncf %63 : vector<8x128xf32> to vector<8x128xbf16>
    %c0_30 = arith.constant 0 : index
    %c0_31 = arith.constant 0 : index
    %65 = vector.load %arg10[%c0_30, %c0_31] : memref<128x128xbf16, #tpu.memory_space<vmem>>, vector<128x128xbf16>
    %cst_32 = arith.constant dense<0.000000e+00> : vector<8x128xf32>
    %66 = tpu.matmul %64, %65, %cst_32 {dimension_numbers = #tpu.dot_dimension_numbers<[1], [0], [0], [1], [0, 0, 1, 1], [], []>} : vector<8x128xbf16>, vector<128x128xbf16>, vector<8x128xf32> -> vector<8x128xf32>
    %c0_33 = arith.constant 0 : index
    %c0_34 = arith.constant 0 : index
    %67 = vector.load %arg11[%c0_33, %c0_34] : memref<1x128xf32, #tpu.memory_space<vmem>>, vector<1x128xf32>
    %68 = vector.broadcast %67 : vector<1x128xf32> to vector<8x128xf32>
    %69 = arith.addf %66, %68 : vector<8x128xf32>
    %c0_35 = arith.constant 0 : index
    %c0_36 = arith.constant 0 : index
    %70 = vector.load %arg12[%c0_35, %c0_36] : memref<8x128xf32, #tpu.memory_space<vmem>>, vector<8x128xf32>
    tpu.vector_store %arg12[%c0_35, %c0_36], %69 {strides = array<i32>} : memref<8x128xf32, #tpu.memory_space<vmem>>, vector<8x128xf32>,
    return
  }
  func.func @transform_0(%arg0: i32) -> (i32, i32) {
    %c0_i32 = arith.constant 0 : i32
    %c0_i32_0 = arith.constant 0 : i32
    return %arg0, %c0_i32 : i32, i32
  }
  func.func @transform_1(%arg0: i32) -> (i32, i32) {
    %c0_i32 = arith.constant 0 : i32
    %c0_i32_0 = arith.constant 0 : i32
    %c0_i32_1 = arith.constant 0 : i32
    return %c0_i32, %c0_i32_0 : i32, i32
  }
  func.func @transform_2(%arg0: i32) -> (i32, i32) {
    %c0_i32 = arith.constant 0 : i32
    %c0_i32_0 = arith.constant 0 : i32
    %c0_i32_1 = arith.constant 0 : i32
    return %c0_i32, %c0_i32_0 : i32, i32
  }
  func.func @transform_3(%arg0: i32) -> (i32, i32) {
    %c0_i32 = arith.constant 0 : i32
    %c0_i32_0 = arith.constant 0 : i32
    %c0_i32_1 = arith.constant 0 : i32
    return %c0_i32, %c0_i32_0 : i32, i32
  }
  func.func @transform_4(%arg0: i32) -> (i32, i32) {
    %c0_i32 = arith.constant 0 : i32
    %c0_i32_0 = arith.constant 0 : i32
    %c0_i32_1 = arith.constant 0 : i32
    return %c0_i32, %c0_i32_0 : i32, i32
  }
  func.func @transform_5(%arg0: i32) -> (i32, i32) {
    %c0_i32 = arith.constant 0 : i32
    %c0_i32_0 = arith.constant 0 : i32
    %c0_i32_1 = arith.constant 0 : i32
    return %c0_i32, %c0_i32_0 : i32, i32
  }
  func.func @transform_6(%arg0: i32) -> (i32, i32) {
    %c0_i32 = arith.constant 0 : i32
    %c0_i32_0 = arith.constant 0 : i32
    %c0_i32_1 = arith.constant 0 : i32
    return %c0_i32, %c0_i32_0 : i32, i32
  }
  func.func @transform_7(%arg0: i32) -> (i32, i32) {
    %c0_i32 = arith.constant 0 : i32
    %c0_i32_0 = arith.constant 0 : i32
    %c0_i32_1 = arith.constant 0 : i32
    return %c0_i32, %c0_i32_0 : i32, i32
  }
  func.func @transform_8(%arg0: i32) -> (i32, i32) {
    %c0_i32 = arith.constant 0 : i32
    %c0_i32_0 = arith.constant 0 : i32
    %c0_i32_1 = arith.constant 0 : i32
    return %c0_i32, %c0_i32_0 : i32, i32
  }
  func.func @transform_9(%arg0: i32) -> (i32, i32) {
    %c0_i32 = arith.constant 0 : i32
    %c0_i32_0 = arith.constant 0 : i32
    %c0_i32_1 = arith.constant 0 : i32
    return %c0_i32, %c0_i32_0 : i32, i32
  }
  func.func @transform_10(%arg0: i32) -> (i32, i32) {
    %c0_i32 = arith.constant 0 : i32
    %c0_i32_0 = arith.constant 0 : i32
    %c0_i32_1 = arith.constant 0 : i32
    return %c0_i32, %c0_i32_0 : i32, i32
  }
  func.func @transform_11(%arg0: i32) -> (i32, i32) {
    %c0_i32 = arith.constant 0 : i32
    %c0_i32_0 = arith.constant 0 : i32
    return %arg0, %c0_i32 : i32, i32
  }
}

</mosaic_0001>

<bundles_post_ra>
// kernel: unified_classifier_forward.1
= control target key start
LH: loop header
LB: loop body
LE: loop exit
PB: predicated region body
PF: predicated region fallthrough
CT: control target
= control target key end

     0   :  { %16 = vsyncpa [#allocation3], 0  ;;  %s868_s0 = inlined_call_operand.vmem [shape: bf16[8,128], index: 0, kind: input, shape index: {}]   ;;  %s869_s1 = inlined_call_operand.hbm [shape: bf16[128,128], index: 1, kind: input, shape index: {}]   ;;  %s870_s2 = inlined_call_operand.vmem [shape: f32[1,128], index: 2, kind: input, shape index: {}]   ;;  %s871_s3 = inlined_call_operand.vmem [shape: f32[1,128], index: 3, kind: input, shape index: {}]   ;;  %s872_s4 = inlined_call_operand.vmem [shape: f32[1,128], index: 4, kind: input, shape index: {}]   ;;  %s873_s5 = inlined_call_operand.hbm [shape: bf16[128,128], index: 5, kind: input, shape index: {}]   ;;  %s874_s6 = inlined_call_operand.vmem [shape: f32[1,128], index: 6, kind: input, shape index: {}]   ;;  %s875_s7 = inlined_call_operand.vmem [shape: f32[1,128], index: 7, kind: input, shape index: {}]   ;;  %s876_s8 = inlined_call_operand.vmem [shape: f32[1,128], index: 8, kind: input, shape index: {}]   ;;  %s877_s9 = inlined_call_operand.hbm [shape: bf16[128,128], index: 9, kind: input, shape index: {}]   ;;  %s878_s10 = inlined_call_operand.vmem [shape: f32[1,128], index: 10, kind: input, shape index: {}]   ;;  %s879_s11 = inlined_call_operand.hbm [shape: f32[8,128], index: 11, kind: output, shape index: {}]  }
   0x1   :  { %17 = vsyncpa [#allocation6], 0 }
   0x2   :  { %18 = vsyncpa [#allocation4], 0  ;;  %s734_s17 = smov [#allocation5]   ;;  %s735_s19 = smov [#allocation2]  }
   0x3   :  { %s44_s18 = sshll.u32 %s734_s17, 4  ;;  %s26_s20 = sshll.u32 %s735_s19, 4  ;;  %s45_s18 = int_to_ptr.vmem [resolvable:$true] %s44_s18  ;;  %s27_s20 = int_to_ptr.vmem [resolvable:$true] %s26_s20 }
   0x4   :  { %s656_s21 = scalar_lea.vmem %s45_s18, 1024  ;;  %p661_p1 = scmp.lt.s32.totalorder %s45_s18, %s45_s18 }
   0x5   :  { %p657_p0 = scmp.ne.s32.totalorder %s45_s18, %s656_s21  ;;  %p662_p2 = scmp.lt.s32.totalorder %s656_s21, %s656_s21 }
   0x7   :  { %p663_p3 = por %p662_p2, %p661_p1 }
   0x9   :  { %p664_p4 = pnand %p663_p3, %p657_p0 }
   0xb   :  { %667 = shalt.err (!%p664_p4)
}
   0xc   :  { %s736_s22 = smov 64   ;;  %s737_s23 = smov 4  }
   0xd   :  { %50 = dma.hbm_to_vmem [thread:$0]  %s873_s5, 1024, %s45_s18, [#allocation6], %s736_s22, %s736_s22, %s737_s23  }
   0xe   :  { %s676_s26 = scalar_lea.vmem %s27_s20, 1024  ;;  %p681_p6 = scmp.lt.s32.totalorder %s27_s20, %s27_s20 }
   0xf   :  { %p677_p5 = scmp.ne.s32.totalorder %s27_s20, %s676_s26  ;;  %p682_p7 = scmp.lt.s32.totalorder %s676_s26, %s676_s26 }
  0x11   :  { %p683_p8 = por %p682_p7, %p681_p6 }
  0x13   :  { %p684_p9 = pnand %p683_p8, %p677_p5 }
  0x15   :  { %687 = shalt.err (!%p684_p9)
}
  0x16   :  { %32 = dma.hbm_to_vmem [thread:$0]  %s869_s1, 1024, %s27_s20, [#allocation3], %s736_s22, %s736_s22, %s737_s23  }
  0x17   :  { %s738_s29 = smov [#allocation7]  }
  0x18   :  { %s62_s30 = sshll.u32 %s738_s29, 4  ;;  %s63_s30 = int_to_ptr.vmem [resolvable:$true] %s62_s30 }
  0x19   :  { %s696_s12 = scalar_lea.vmem %s63_s30, 1024  ;;  %p701_p11 = scmp.lt.s32.totalorder %s63_s30, %s63_s30 }
  0x1a   :  { %p697_p10 = scmp.ne.s32.totalorder %s63_s30, %s696_s12  ;;  %p702_p12 = scmp.lt.s32.totalorder %s696_s12, %s696_s12 }
  0x1c   :  { %p703_p13 = por %p702_p12, %p701_p11 }
  0x1e   :  { %p704_p0 = pnand %p703_p13, %p697_p10 }
  0x20   :  { %707 = shalt.err (!%p704_p0)
}
  0x21   :  { %68 = dma.hbm_to_vmem [thread:$0]  %s877_s9, 1024, %s63_s30, [#allocation6], %s736_s22, %s736_s22, %s737_s23  }
  0x22   :  { %728 = dma.done.wait [#allocation3], 1024  }
  0x23   :  { %729 = vsyncadd [#allocation3], 4294966272 }
  0x24   :  { %730 = dma.done.wait [#allocation6], 2048  }
  0x25   :  { %731 = vsyncadd [#allocation6], 4294965248  ;;  %v739_v0 = vmov 0.0   ;;  %vm740_vm0 = vmmov 0   ;;  %v620_v1 = vld [vmem:[#allocation2 + $0x38] sm:$0xff]   ;;  %v621_v2 = vld [vmem:[#allocation2 + $0x30] sm:$0xff]  }
  0x26   :  { %552 = vmatprep.subr.bf16.mxu0 %v739_v0  ;;  %568 = vmatprep.mubr.msk.bf16.mxu0 %vm740_vm0, %v739_v0  ;;  %v622_v3 = vld [vmem:[#allocation2 + $0x28] sm:$0xff]   ;;  %v623_v4 = vld [vmem:[#allocation2 + $0x20] sm:$0xff]   ;;  %v624_v5 = vld [vmem:[#allocation2 + $0x18] sm:$0xff]   ;;  %s741_s23 = smov [#allocation8]  }
  0x27   :  { %572 = vmatprep.subr.bf16.mxu1 %v739_v0  ;;  %588 = vmatprep.mubr.msk.bf16.mxu1 %vm740_vm0, %v739_v0  ;;  %v625_v6 = vld [vmem:[#allocation2 + $0x10] sm:$0xff]   ;;  %v626_v7 = vld [vmem:[#allocation2 + $0x8] sm:$0xff]   ;;  %v627_v8 = vld [vmem:[#allocation2] sm:$0xff]   ;;  %s484_s24 = sshll.u32 %s741_s23, 4  ;;  %s485_s24 = int_to_ptr.vmem [resolvable:$true] %s484_s24 }
  0x28   :  { %553 = vmatpush3.bf16.msra.mxu0 %v620_v1  ;;  %v81_v9 = vld [vmem:[%s868_s0] sm:$0xf]  ;;  %v628_v17 = vld [vmem:[#allocation5 + $0x38] sm:$0xff]   ;;  %v629_v18 = vld [vmem:[#allocation5 + $0x30] sm:$0xff]   ;;  %p713_p2 = scmp.lt.s32.totalorder %s485_s24, %s485_s24 }
  0x29   :  { %554 = vmatprep.subr.bf16.mxu0 %v739_v0  ;;  %v494_v10 = vld [vmem:[%s870_s2] ss:$0 sm:$0xff]  ;;  %573 = vmatpush3.bf16.msra.mxu1 %v628_v17  ;;  %v630_v19 = vld [vmem:[#allocation5 + $0x28] sm:$0xff]   ;;  %v632_v21 = vld [vmem:[#allocation5 + $0x18] sm:$0xff]  }
  0x2a   :  { %574 = vmatprep.subr.bf16.mxu1 %v739_v0  ;;  %v631_v20 = vld [vmem:[#allocation5 + $0x20] sm:$0xff]   ;;  %v633_v22 = vld [vmem:[#allocation5 + $0x10] sm:$0xff]   ;;  %v634_v23 = vld [vmem:[#allocation5 + $0x8] sm:$0xff]  }
  0x2b   :  { %v635_v24 = vld [vmem:[#allocation5] sm:$0xff]   ;;  %v636_v48 = vld [vmem:[#allocation7 + $0x38] sm:$0xff]   ;;  %v637_v49 = vld [vmem:[#allocation7 + $0x30] sm:$0xff]  }
  0x2c   :  { %555 = vmatpush3.bf16.msra.mxu0 %v621_v2  ;;  %v503_v34 = vld [vmem:[%s871_s3] ss:$0 sm:$0xff]  ;;  %v638_v50 = vld [vmem:[#allocation7 + $0x28] sm:$0xff]   ;;  %v640_v52 = vld [vmem:[#allocation7 + $0x18] sm:$0xff]  }
  0x2d   :  { %556 = vmatprep.subr.bf16.mxu0 %v739_v0  ;;  %575 = vmatpush3.bf16.msra.mxu1 %v629_v18  ;;  %v504_v36 = vld [vmem:[%s872_s4] ss:$0 sm:$0xff]  ;;  %v641_v53 = vld [vmem:[#allocation7 + $0x10] sm:$0xff]   ;;  %v642_v54 = vld [vmem:[#allocation7 + $0x8] sm:$0xff]  }
  0x2e   :  { %576 = vmatprep.subr.bf16.mxu1 %v739_v0  ;;  %v505_v41 = vld [vmem:[%s874_s6] ss:$0 sm:$0xff] }
  0x2f   :  { %v639_v51 = vld [vmem:[#allocation7 + $0x20] sm:$0xff]  }
  0x30   :  { %557 = vmatpush3.bf16.msra.mxu0 %v622_v3  ;;  %v643_v55 = vld [vmem:[#allocation7] sm:$0xff]  }
  0x31   :  { %558 = vmatprep.subr.bf16.mxu0 %v739_v0  ;;  %577 = vmatpush3.bf16.msra.mxu1 %v630_v19  ;;  %v514_v2 = vld [vmem:[%s875_s7] ss:$0 sm:$0xff]  ;;  %s708_s7 = scalar_lea.vmem %s485_s24, 128 }
  0x32   :  { %578 = vmatprep.subr.bf16.mxu1 %v739_v0  ;;  %p709_p1 = scmp.ne.s32.totalorder %s485_s24, %s708_s7  ;;  %p714_p3 = scmp.lt.s32.totalorder %s708_s7, %s708_s7 }
  0x34   :  { %559 = vmatpush3.bf16.msra.mxu0 %v623_v4  ;;  %p715_p4 = por %p714_p3, %p713_p2 }
  0x35   :  { %560 = vmatprep.subr.bf16.mxu0 %v739_v0  ;;  %579 = vmatpush3.bf16.msra.mxu1 %v631_v20 }
  0x36   :  { %580 = vmatprep.subr.bf16.mxu1 %v739_v0  ;;  %p716_p5 = pnand %p715_p4, %p709_p1 }
  0x38   :  { %561 = vmatpush3.bf16.msra.mxu0 %v624_v5 }
  0x39   :  { %562 = vmatprep.subr.bf16.mxu0 %v739_v0  ;;  %581 = vmatpush3.bf16.msra.mxu1 %v632_v21 }
  0x3a   :  { %582 = vmatprep.subr.bf16.mxu1 %v739_v0 }
  0x3c   :  { %563 = vmatpush3.bf16.msra.mxu0 %v625_v6 }
  0x3d   :  { %564 = vmatprep.subr.bf16.mxu0 %v739_v0  ;;  %583 = vmatpush3.bf16.msra.mxu1 %v633_v22 }
  0x3e   :  { %584 = vmatprep.subr.bf16.mxu1 %v739_v0 }
  0x40   :  { %565 = vmatpush3.bf16.msra.mxu0 %v626_v7 }
  0x41   :  { %566 = vmatprep.subr.bf16.mxu0 %v739_v0  ;;  %585 = vmatpush3.bf16.msra.mxu1 %v634_v23 }
  0x42   :  { %586 = vmatprep.subr.bf16.mxu1 %v739_v0 }
  0x44   :  { %567 = vmatpush3.bf16.msra.mxu0 %v627_v8  ;;  %v516_v8 = vld [vmem:[%s878_s10] ss:$0 sm:$0xff] }
  0x45   :  { %592 = vmatprep.subr.bf16.mxu0 %v739_v0  ;;  %587 = vmatpush3.bf16.msra.mxu1 %v635_v24 }
  0x47   :  { %569 = vmatmul.mubr.bf16.vlgmr.msra.gmra.mxu0 %v81_v9 }
  0x48   :  { %608 = vmatprep.mubr.msk.bf16.mxu0 %vm740_vm0, %v739_v0  ;;  %593 = vmatpush3.bf16.msra.mxu0 %v636_v48 }
  0x49   :  { %594 = vmatprep.subr.bf16.mxu0 %v739_v0 }
  0x4c   :  { %595 = vmatpush3.bf16.msra.mxu0 %v637_v49 }
  0x4d   :  { %596 = vmatprep.subr.bf16.mxu0 %v739_v0 }
  0x50   :  { %597 = vmatpush3.bf16.msra.mxu0 %v638_v50 }
  0x51   :  { %598 = vmatprep.subr.bf16.mxu0 %v739_v0 }
  0x54   :  { %599 = vmatpush3.bf16.msra.mxu0 %v639_v51 }
  0x55   :  { %600 = vmatprep.subr.bf16.mxu0 %v739_v0 }
  0x58   :  { %601 = vmatpush3.bf16.msra.mxu0 %v640_v52 }
  0x59   :  { %602 = vmatprep.subr.bf16.mxu0 %v739_v0 }
  0x5c   :  { %603 = vmatpush3.bf16.msra.mxu0 %v641_v53 }
  0x5d   :  { %604 = vmatprep.subr.bf16.mxu0 %v739_v0 }
  0x60   :  { %605 = vmatpush3.bf16.msra.mxu0 %v642_v54 }
  0x61   :  { %606 = vmatprep.subr.bf16.mxu0 %v739_v0  ;;  %v515_v0 = vld [vmem:[%s876_s8] ss:$0 sm:$0xff] }
  0x64   :  { %607 = vmatpush3.bf16.msra.mxu0 %v643_v55 }
 0x107   :  { %v187_v11 = vpop.f32.mrf.mxu0 }
 0x108   :  { %v188_v12 = vadd.f32 %v494_v10, %v187_v11 }
 0x109   :  { %v570_v13 = vpop.f32.mrf.mxu0 }
 0x10a   :  { %193 = vadd.xlane.f32.xlu0 %v188_v12  ;;  %v195_v15 = vmul.f32 %v188_v12, %v188_v12 }
 0x10b   :  { %v190_v14 = vpop.f32.mrf.mxu0 }
 0x10d   :  { %v571_v16 = vpop.f32.mrf.mxu0 }
 0x10e   :  { %196 = vadd.xlane.f32.xlu0 %v195_v15 }
 0x193   :  { %v194_v25 = vpop.xlane.xlu0 %193 }
 0x194   :  { %v198_v26 = vmul.f32 0.015625, %v194_v25 }
 0x196   :  { %v200_v28 = vmul.f32 %v198_v26, %v198_v26  ;;  %v202_v32 = vsub.f32 %v188_v12, %v198_v26 }
 0x197   :  { %v197_v27 = vpop.xlane.xlu0 %196 }
 0x198   :  { %v199_v29 = vmul.f32 0.015625, %v197_v27 }
 0x19a   :  { %v201_v30 = vsub.f32 %v199_v29, %v200_v28 }
 0x19c   :  { %v203_v31 = vadd.f32 1e-05, %v201_v30 }
 0x19e   :  { %644 = vrsqrt.f32 %v203_v31 }
 0x1ab   :  { %v645_v33 = vpop.eup %644 }
 0x1ac   :  { %v205_v35 = vmul.f32 %v645_v33, %v202_v32 }
 0x1ae   :  { %v213_v37 = vmul.f32 %v503_v34, %v205_v35 }
 0x1b0   :  { %v221_v38 = vadd.f32 %v504_v36, %v213_v37 }
 0x1b2   :  { %v222_v39 = vmax.f32 %v221_v38, 0.0 }
 0x1b4   :  { %v223_v40 = vpack.c.bf16 %v222_v39, %v222_v39 }
 0x1b6   :  { %589 = vmatmul.mubr.bf16.vlgmr.msra.gmra.mxu1 %v223_v40 }
 0x276   :  { %v329_v42 = vpop.f32.mrf.mxu1 }
 0x277   :  { %v330_v43 = vadd.f32 %v505_v41, %v329_v42 }
 0x278   :  { %v590_v44 = vpop.f32.mrf.mxu1 }
 0x279   :  { %335 = vadd.xlane.f32.xlu1 %v330_v43  ;;  %v337_v46 = vmul.f32 %v330_v43, %v330_v43 }
 0x27a   :  { %v332_v45 = vpop.f32.mrf.mxu1 }
 0x27c   :  { %v591_v47 = vpop.f32.mrf.mxu1 }
 0x27d   :  { %338 = vadd.xlane.f32.xlu1 %v337_v46 }
 0x302   :  { %v336_v56 = vpop.xlane.xlu1 %335 }
 0x303   :  { %v340_v57 = vmul.f32 0.03125, %v336_v56 }
 0x305   :  { %v342_v59 = vmul.f32 %v340_v57, %v340_v57  ;;  %v344_v63 = vsub.f32 %v330_v43, %v340_v57 }
 0x306   :  { %v339_v58 = vpop.xlane.xlu1 %338 }
 0x307   :  { %v341_v60 = vmul.f32 0.03125, %v339_v58 }
 0x309   :  { %v343_v61 = vsub.f32 %v341_v60, %v342_v59 }
 0x30b   :  { %v345_v62 = vadd.f32 1e-05, %v343_v61 }
 0x30d   :  { %646 = vrsqrt.f32 %v345_v62 }
 0x31a   :  { %v647_v1 = vpop.eup %646 }
 0x31b   :  { %v347_v3 = vmul.f32 %v647_v1, %v344_v63 }
 0x31d   :  { %v355_v4 = vmul.f32 %v514_v2, %v347_v3 }
 0x31f   :  { %v363_v5 = vadd.f32 %v515_v0, %v355_v4 }
 0x321   :  { %v364_v6 = vmax.f32 %v363_v5, 0.0 }
 0x323   :  { %v365_v7 = vpack.c.bf16 %v364_v6, %v364_v6 }
 0x325   :  { %609 = vmatmul.mubr.bf16.vlgmr.msra.gmra.mxu0 %v365_v7 }
 0x3e5   :  { %v471_v9 = vpop.f32.mrf.mxu0 }
 0x3e6   :  { %v472_v10 = vadd.f32 %v516_v8, %v471_v9 }
 0x3e7   :  { %v610_v11 = vpop.f32.mrf.mxu0 }
 0x3e8   :  { %477 = vst [vmem:[#allocation8] sm:$0xff] %v472_v10 }
 0x3e9   :  { %v474_v12 = vpop.f32.mrf.mxu0 }
 0x3ea   :  { %719 = shalt.err (!%p716_p5)
}
 0x3eb   :  { %487 = dma.vmem_to_hbm [thread:$0]  %s485_s24, 128, %s879_s11, [#allocation4]   ;;  %v611_v13 = vpop.f32.mrf.mxu0 }
 0x3ec   :  { %732 = dma.done.wait [#allocation4], 128  }
 0x3ed   :  { %733 = vsyncadd [#allocation4], 4294967168 }
 0x3ee   :  { %491 = vsyncpa [#allocation3], 1 }
 0x3ef   :  { %492 = vsyncpa [#allocation6], 1 }
 0x3f0   :  { %493 = vsyncpa [#allocation4], 1 }

</bundles_post_ra>
